<compile_context>
chip_gen: v7x
topology: tpu7x:2x2x1
jax: 0.10.0
libtpu: 0.0.40
codegen_flags: <defaults>
</compile_context>

<pallas_src>
import functools

import jax
import jax.numpy as jnp
from jax.experimental import pallas as pl
from jax.experimental.pallas import tpu as pltpu


def graphvae_kernel(
    x_ref,       # (bt*N, D_in) bf16   [node_features, node_positions] flattened
    sel_ref,     # (bt, bt*N)   bf16   block-diag selector with 1/(count+1e-6) folded in
    eps_ref,     # (bt, L)      f32    reparameterization noise
    w1_ref,      # (D_in, H)    bf16   node_encoder linear 1
    w2_ref,      # (H, H)       bf16   node_encoder linear 2
    wg_ref,      # (H, H)       bf16   graph_encoder linear
    wd1_ref,     # (L, H)       bf16   decoder linear 1
    wheads_ref,  # (H, W)       bf16   [wmu | wlv] in cols [0:2L], zeros elsewhere
    wd2p_ref,    # (H, W)       bf16   wd2 in cols [2L:2L+N*D_in], zeros elsewhere
    bh_ref,      # (4, H)       f32    rows: b1, b2, bg, bd1
    bpack_ref,   # (1, W)       f32    [bmu | blv | bd2 | 0]
    out_ref,     # (bt, W)      f32    [mu | logvar | recon | 0]  lane-dense slab
    *, latent,
):
    f32 = jnp.float32
    bf16 = jnp.bfloat16

    # ---- node encoder: Linear -> ReLU -> Linear on every (graph, node) row ----
    x = x_ref[...]
    h = jnp.dot(x, w1_ref[...], preferred_element_type=f32) + bh_ref[0:1, :]
    h = jnp.maximum(h, 0.0)
    h = jnp.dot(h.astype(bf16), w2_ref[...], preferred_element_type=f32) + bh_ref[1:2, :]

    # ---- masked mean pooling over nodes ----
    # Mask + mean normalization are folded into the precomputed selector; one
    # single-pass bf16 MXU matmul does the per-graph reduction.
    pooled = jnp.dot(sel_ref[...], h.astype(bf16), preferred_element_type=f32)  # (bt, H)

    # ---- graph encoder: Linear -> ReLU ----
    g = jnp.dot(pooled.astype(bf16), wg_ref[...], preferred_element_type=f32) + bh_ref[2:3, :]
    g = jnp.maximum(g, 0.0)
    g_bf = g.astype(bf16)

    # ---- fused mu/logvar heads, written straight into the lane-dense slab ----
    hb = jnp.dot(g_bf, wheads_ref[...], preferred_element_type=f32) + bpack_ref[...]
    mu = hb[:, :latent]
    logvar = hb[:, latent:2 * latent]

    # ---- reparameterize (f32 VPU/EUP): z = mu + eps * exp(0.5 * logvar) ----
    z = mu + eps_ref[...] * jnp.exp(0.5 * logvar)

    # ---- decoder: Linear -> ReLU -> Linear (into the recon columns of the slab) ----
    d = jnp.dot(z.astype(bf16), wd1_ref[...], preferred_element_type=f32) + bh_ref[3:4, :]
    d = jnp.maximum(d, 0.0)
    recon_part = jnp.dot(d.astype(bf16), wd2p_ref[...], preferred_element_type=f32)

    # hb carries bd2 (and zeros) in the recon/pad columns; recon_part is exactly
    # zero in the head/pad columns, so one add + one full-width store finishes.
    out_ref[...] = hb + recon_part


def init_params(key, *, input_dim, hidden_dim, latent_features, max_nodes):
    """Deterministic synthetic parameters (weights stored as (in, out))."""
    def lin(k, fan_in, fan_out):
        kw, kb = jax.random.split(k)
        w = jax.random.normal(kw, (fan_in, fan_out), jnp.float32) * 0.1
        b = jax.random.normal(kb, (1, fan_out), jnp.float32) * 0.01
        return w, b

    keys = jax.random.split(key, 7)
    w1, b1 = lin(keys[0], input_dim, hidden_dim)
    w2, b2 = lin(keys[1], hidden_dim, hidden_dim)
    wg, bg = lin(keys[2], hidden_dim, hidden_dim)
    wmu, bmu = lin(keys[3], hidden_dim, latent_features)
    wlv, blv = lin(keys[4], hidden_dim, latent_features)
    wd1, bd1 = lin(keys[5], latent_features, hidden_dim)
    wd2, bd2 = lin(keys[6], hidden_dim, max_nodes * input_dim)
    return (w1, b1, w2, b2, wg, bg, wmu, bmu, wlv, blv, wd1, bd1, wd2, bd2)


def _pick_batch_tile(B):
    """Batch tile: big enough to amortize per-step overhead, >=2 grid steps for
    v7x megacore when B allows, multiple of 8 (sublane alignment)."""
    if B <= 8:
        return B
    bt = min(64, (B // 2 // 8) * 8)   # cap at 64 graphs (rows = 64*N), keep >=2 steps
    return max(bt, 8)


@functools.partial(jax.jit, static_argnames=("max_nodes", "input_dim", "latent_features"))
def graphvae_forward(node_features, node_positions, mask, eps, params,
                     *, max_nodes, input_dim, latent_features):
    B, N, _ = node_features.shape
    assert N == max_nodes
    L = latent_features
    RD = max_nodes * input_dim

    (w1, b1, w2, b2, wg, bg, wmu, bmu, wlv, blv, wd1, bd1, wd2, bd2) = params
    H = w1.shape[1]
    f32, bf16 = jnp.float32, jnp.bfloat16

    # ---- batch tiling (whole forward is independent per graph -> "parallel") ----
    bt = _pick_batch_tile(B)
    n_steps = pl.cdiv(B, bt)
    B_pad = n_steps * bt
    grid = (n_steps,)

    # lane-dense output slab width (>= 128, multiple of 128)
    W = max(128, ((2 * L + RD + 127) // 128) * 128)

    # ---- wrapper-side glue (layout only, traced once; no hot-loop compute) ----
    pad_b = B_pad - B
    nf = jnp.pad(node_features, ((0, pad_b), (0, 0), (0, 0)))
    npos = jnp.pad(node_positions, ((0, pad_b), (0, 0), (0, 0)))
    maskp = jnp.pad(mask, ((0, pad_b), (0, 0)))
    epsp = jnp.pad(eps.astype(f32), ((0, pad_b), (0, 0)))

    x = jnp.concatenate([nf, npos], axis=-1)                     # (B_pad, N, D_in)
    x2d = x.reshape(B_pad * N, input_dim).astype(bf16)           # MXU operand

    # mask-scaled block-diagonal pooling selector, laid out per batch tile:
    # sel[g, (g % bt)*N + n] = mask[g, n] / (count[g] + 1e-6)
    maskf = maskp.astype(f32)
    counts = jnp.sum(maskf, axis=1, keepdims=True)               # (B_pad, 1)
    m_scaled = maskf / (counts + 1e-6)                           # (B_pad, N)
    g_local = (jnp.arange(B_pad) % bt)[:, None]                  # (B_pad, 1)
    onehot = (g_local == jnp.arange(bt)[None, :]).astype(f32)    # (B_pad, bt)
    sel = (onehot[:, :, None] * m_scaled[:, None, :]).reshape(B_pad, bt * N).astype(bf16)

    # pack / pad parameters (tiny tensors, traced once)
    w1b, w2b, wgb, wd1b = (w.astype(bf16) for w in (w1, w2, wg, wd1))
    wheads = jnp.zeros((H, W), f32).at[:, :2 * L].set(
        jnp.concatenate([wmu, wlv], axis=1)).astype(bf16)
    wd2p = jnp.zeros((H, W), f32).at[:, 2 * L:2 * L + RD].set(wd2).astype(bf16)
    bh = jnp.concatenate([b1, b2, bg, bd1], axis=0).astype(f32)  # (4, H)
    bpack = (jnp.zeros((1, W), f32)
             .at[:, :2 * L].set(jnp.concatenate([bmu, blv], axis=1))
             .at[:, 2 * L:2 * L + RD].set(bd2))

    def full(a):  # whole array resident in VMEM, same block every grid step
        return pl.BlockSpec(a.shape, lambda i: (0,) * a.ndim)

    kernel = functools.partial(graphvae_kernel, latent=L)

    out = pl.pallas_call(
        kernel,
        out_shape=jax.ShapeDtypeStruct((B_pad, W), f32),
        grid=grid,
        in_specs=[
            pl.BlockSpec((bt * N, input_dim), lambda i: (i, 0)),   # x (per batch tile)
            pl.BlockSpec((bt, bt * N), lambda i: (i, 0)),          # pooling selector
            pl.BlockSpec((bt, L), lambda i: (i, 0)),               # eps
            full(w1b), full(w2b), full(wgb), full(wd1b),
            full(wheads), full(wd2p), full(bh), full(bpack),
        ],
        out_specs=pl.BlockSpec((bt, W), lambda i: (i, 0)),
        compiler_params=pltpu.CompilerParams(
            dimension_semantics=("parallel",),        # megacore / both v7x TCs at large B
            vmem_limit_bytes=32 * 1024 * 1024,
        ),
    )(x2d, sel, epsp, w1b, w2b, wgb, wd1b, wheads, wd2p, bh, bpack)

    mu = out[:B, :L]
    logvar = out[:B, L:2 * L]
    recon = out[:B, 2 * L:2 * L + RD].reshape(B, max_nodes, input_dim)
    return recon, mu, logvar


def reference_forward(node_features, node_positions, mask, eps, params):
    """Pure-JAX f32 reference mirroring the PyTorch module semantics."""
    (w1, b1, w2, b2, wg, bg, wmu, bmu, wlv, blv, wd1, bd1, wd2, bd2) = params
    x = jnp.concatenate([node_features, node_positions], axis=-1)
    B, N, D = x.shape
    h = jnp.maximum(x.reshape(B * N, D) @ w1 + b1, 0.0) @ w2 + b2
    h = h.reshape(B, N, -1) * mask[..., None]
    sum_h = h.sum(axis=1)
    counts = mask[..., None].sum(axis=1)
    pooled = sum_h / (counts + 1e-6)
    g = jnp.maximum(pooled @ wg + bg, 0.0)
    mu = g @ wmu + bmu
    logvar = g @ wlv + blv
    z = mu + eps * jnp.exp(0.5 * logvar)
    out = jnp.maximum(z @ wd1 + bd1, 0.0) @ wd2 + bd2
    return out.reshape(B, N, D), mu, logvar


if __name__ == "__main__":
    # small shapes consistent with the module
    B = 2
    max_nodes = 8
    node_feature_dim = 1
    position_dim = 3
    input_dim = node_feature_dim + position_dim   # 4
    hidden_dim = 32
    latent_features = 8

    key = jax.random.PRNGKey(0)
    k_feat, k_pos, k_mask, k_eps, k_params = jax.random.split(key, 5)

    node_features = jax.random.normal(k_feat, (B, max_nodes, node_feature_dim), jnp.float32)
    node_positions = jax.random.normal(k_pos, (B, max_nodes, position_dim), jnp.float32)
    mask = (jax.random.uniform(k_mask, (B, max_nodes)) > 0.25).astype(jnp.float32)
    mask = mask.at[:, 0].set(1.0)  # ensure at least one real node per graph
    # TODO(synk): torch.randn_like noise has no bit-exact JAX equivalent; eps is an
    # explicit jax.random.normal input (same distribution, deterministic here).
    eps = jax.random.normal(k_eps, (B, latent_features), jnp.float32)

    params = init_params(
        k_params,
        input_dim=input_dim,
        hidden_dim=hidden_dim,
        latent_features=latent_features,
        max_nodes=max_nodes,
    )

    recon, mu, logvar = graphvae_forward(
        node_features, node_positions, mask, eps, params,
        max_nodes=max_nodes, input_dim=input_dim, latent_features=latent_features,
    )
    jax.block_until_ready((recon, mu, logvar))

    # correctness check vs pure-JAX f32 reference (kernel uses bf16 MXU operands,
    # a bf16 mask-scaled pooling selector, and f32 accumulation -> modest tolerance)
    recon_r, mu_r, logvar_r = reference_forward(node_features, node_positions, mask, eps, params)
    assert recon.shape == (B, max_nodes, input_dim)
    assert mu.shape == (B, latent_features) and logvar.shape == (B, latent_features)
    tol = dict(atol=2e-2, rtol=2e-2)
    assert jnp.allclose(mu, mu_r, **tol), "mu mismatch"
    assert jnp.allclose(logvar, logvar_r, **tol), "logvar mismatch"
    assert jnp.allclose(recon, recon_r, **tol), "recon mismatch"

    print("KERNEL_OK")
</pallas_src>

<mosaic_0001>
module attributes {stable_mosaic.version = 11 : i64} {
  func.func @graphvae_kernel(%arg0: i32, %arg1: memref<16x4xbf16, #tpu.memory_space<vmem>>, %arg2: memref<2x16xbf16, #tpu.memory_space<vmem>>, %arg3: memref<2x8xf32, #tpu.memory_space<vmem>>, %arg4: memref<4x32xbf16, #tpu.memory_space<vmem>>, %arg5: memref<32x32xbf16, #tpu.memory_space<vmem>>, %arg6: memref<32x32xbf16, #tpu.memory_space<vmem>>, %arg7: memref<8x32xbf16, #tpu.memory_space<vmem>>, %arg8: memref<32x128xbf16, #tpu.memory_space<vmem>>, %arg9: memref<32x128xbf16, #tpu.memory_space<vmem>>, %arg10: memref<4x32xf32, #tpu.memory_space<vmem>>, %arg11: memref<1x128xf32, #tpu.memory_space<vmem>>, %arg12: memref<2x128xf32, #tpu.memory_space<vmem>>) attributes {dimension_semantics = [#tpu.dimension_semantics<parallel>], iteration_bounds = array<i64: 1>, scalar_prefetch = 0 : i64, scratch_operands = 0 : i64, tpu.core_type = #tpu.core_type<tc>, window_params = [{transform_indices = @transform_0, window_bounds = array<i64: 16, 4>}, {transform_indices = @transform_1, window_bounds = array<i64: 2, 16>}, {transform_indices = @transform_2, window_bounds = array<i64: 2, 8>}, {pipeline_mode = #tpu.pipeline_mode<synchronous>, transform_indices = @transform_3, window_bounds = array<i64: 4, 32>}, {pipeline_mode = #tpu.pipeline_mode<synchronous>, transform_indices = @transform_4, window_bounds = array<i64: 32, 32>}, {pipeline_mode = #tpu.pipeline_mode<synchronous>, transform_indices = @transform_5, window_bounds = array<i64: 32, 32>}, {pipeline_mode = #tpu.pipeline_mode<synchronous>, transform_indices = @transform_6, window_bounds = array<i64: 8, 32>}, {pipeline_mode = #tpu.pipeline_mode<synchronous>, transform_indices = @transform_7, window_bounds = array<i64: 32, 128>}, {pipeline_mode = #tpu.pipeline_mode<synchronous>, transform_indices = @transform_8, window_bounds = array<i64: 32, 128>}, {pipeline_mode = #tpu.pipeline_mode<synchronous>, transform_indices = @transform_9, window_bounds = array<i64: 4, 32>}, {pipeline_mode = #tpu.pipeline_mode<synchronous>, transform_indices = @transform_10, window_bounds = array<i64: 1, 128>}, {transform_indices = @transform_11, window_bounds = array<i64: 2, 128>}]} {
    %c0 = arith.constant 0 : index
    %c0_0 = arith.constant 0 : index
    %0 = vector.load %arg1[%c0, %c0_0] : memref<16x4xbf16, #tpu.memory_space<vmem>>, vector<16x4xbf16>
    %c0_1 = arith.constant 0 : index
    %c0_2 = arith.constant 0 : index
    %1 = vector.load %arg4[%c0_1, %c0_2] : memref<4x32xbf16, #tpu.memory_space<vmem>>, vector<4x32xbf16>
    %cst = arith.constant dense<0.000000e+00> : vector<16x32xf32>
    %2 = tpu.matmul %0, %1, %cst {dimension_numbers = #tpu.dot_dimension_numbers<[1], [0], [0], [1], [0, 0, 1, 1], [], []>} : vector<16x4xbf16>, vector<4x32xbf16>, vector<16x32xf32> -> vector<16x32xf32>
    %c0_3 = arith.constant 0 : index
    %c0_4 = arith.constant 0 : index
    %3 = vector.load %arg10[%c0_3, %c0_4] : memref<4x32xf32, #tpu.memory_space<vmem>>, vector<1x32xf32>
    %4 = vector.broadcast %3 : vector<1x32xf32> to vector<16x32xf32>
    %5 = arith.addf %2, %4 : vector<16x32xf32>
    %cst_5 = arith.constant 0.000000e+00 : f32
    %6 = vector.broadcast %cst_5 : f32 to vector<16x32xf32>
    %7 = arith.maximumf %5, %6 : vector<16x32xf32>
    %8 = arith.truncf %7 : vector<16x32xf32> to vector<16x32xbf16>
    %c0_6 = arith.constant 0 : index
    %c0_7 = arith.constant 0 : index
    %9 = vector.load %arg5[%c0_6, %c0_7] : memref<32x32xbf16, #tpu.memory_space<vmem>>, vector<32x32xbf16>
    %cst_8 = arith.constant dense<0.000000e+00> : vector<16x32xf32>
    %10 = tpu.matmul %8, %9, %cst_8 {dimension_numbers = #tpu.dot_dimension_numbers<[1], [0], [0], [1], [0, 0, 1, 1], [], []>} : vector<16x32xbf16>, vector<32x32xbf16>, vector<16x32xf32> -> vector<16x32xf32>
    %c1 = arith.constant 1 : index
    %c0_9 = arith.constant 0 : index
    %11 = vector.load %arg10[%c1, %c0_9] : memref<4x32xf32, #tpu.memory_space<vmem>>, vector<1x32xf32>
    %12 = vector.broadcast %11 : vector<1x32xf32> to vector<16x32xf32>
    %13 = arith.addf %10, %12 : vector<16x32xf32>
    %c0_10 = arith.constant 0 : index
    %c0_11 = arith.constant 0 : index
    %14 = vector.load %arg2[%c0_10, %c0_11] : memref<2x16xbf16, #tpu.memory_space<vmem>>, vector<2x16xbf16>
    %15 = arith.truncf %13 : vector<16x32xf32> to vector<16x32xbf16>
    %cst_12 = arith.constant dense<0.000000e+00> : vector<2x32xf32>
    %16 = tpu.matmul %14, %15, %cst_12 {dimension_numbers = #tpu.dot_dimension_numbers<[1], [0], [0], [1], [0, 0, 1, 1], [], []>} : vector<2x16xbf16>, vector<16x32xbf16>, vector<2x32xf32> -> vector<2x32xf32>
    %17 = arith.truncf %16 : vector<2x32xf32> to vector<2x32xbf16>
    %c0_13 = arith.constant 0 : index
    %c0_14 = arith.constant 0 : index
    %18 = vector.load %arg6[%c0_13, %c0_14] : memref<32x32xbf16, #tpu.memory_space<vmem>>, vector<32x32xbf16>
    %cst_15 = arith.constant dense<0.000000e+00> : vector<2x32xf32>
    %19 = tpu.matmul %17, %18, %cst_15 {dimension_numbers = #tpu.dot_dimension_numbers<[1], [0], [0], [1], [0, 0, 1, 1], [], []>} : vector<2x32xbf16>, vector<32x32xbf16>, vector<2x32xf32> -> vector<2x32xf32>
    %c2 = arith.constant 2 : index
    %c0_16 = arith.constant 0 : index
    %20 = vector.load %arg10[%c2, %c0_16] : memref<4x32xf32, #tpu.memory_space<vmem>>, vector<1x32xf32>
    %21 = vector.broadcast %20 : vector<1x32xf32> to vector<2x32xf32>
    %22 = arith.addf %19, %21 : vector<2x32xf32>
    %cst_17 = arith.constant 0.000000e+00 : f32
    %23 = vector.broadcast %cst_17 : f32 to vector<2x32xf32>
    %24 = arith.maximumf %22, %23 : vector<2x32xf32>
    %25 = arith.truncf %24 : vector<2x32xf32> to vector<2x32xbf16>
    %c0_18 = arith.constant 0 : index
    %c0_19 = arith.constant 0 : index
    %26 = vector.load %arg8[%c0_18, %c0_19] : memref<32x128xbf16, #tpu.memory_space<vmem>>, vector<32x128xbf16>
    %cst_20 = arith.constant dense<0.000000e+00> : vector<2x128xf32>
    %27 = tpu.matmul %25, %26, %cst_20 {dimension_numbers = #tpu.dot_dimension_numbers<[1], [0], [0], [1], [0, 0, 1, 1], [], []>} : vector<2x32xbf16>, vector<32x128xbf16>, vector<2x128xf32> -> vector<2x128xf32>
    %c0_21 = arith.constant 0 : index
    %c0_22 = arith.constant 0 : index
    %28 = vector.load %arg11[%c0_21, %c0_22] : memref<1x128xf32, #tpu.memory_space<vmem>>, vector<1x128xf32>
    %29 = vector.broadcast %28 : vector<1x128xf32> to vector<2x128xf32>
    %30 = arith.addf %27, %29 : vector<2x128xf32>
    %31 = vector.extract_strided_slice %30 {offsets = [0, 0], sizes = [2, 8], strides = [1, 1]} : vector<2x128xf32> to vector<2x8xf32>
    %32 = vector.extract_strided_slice %30 {offsets = [0, 8], sizes = [2, 8], strides = [1, 1]} : vector<2x128xf32> to vector<2x8xf32>
    %c0_23 = arith.constant 0 : index
    %c0_24 = arith.constant 0 : index
    %33 = vector.load %arg3[%c0_23, %c0_24] : memref<2x8xf32, #tpu.memory_space<vmem>>, vector<2x8xf32>
    %cst_25 = arith.constant 5.000000e-01 : f32
    %34 = vector.broadcast %cst_25 : f32 to vector<2x8xf32>
    %35 = arith.mulf %34, %32 : vector<2x8xf32>
    %36 = math.exp %35 : vector<2x8xf32>
    %37 = arith.mulf %33, %36 : vector<2x8xf32>
    %38 = arith.addf %31, %37 : vector<2x8xf32>
    %39 = arith.truncf %38 : vector<2x8xf32> to vector<2x8xbf16>
    %c0_26 = arith.constant 0 : index
    %c0_27 = arith.constant 0 : index
    %40 = vector.load %arg7[%c0_26, %c0_27] : memref<8x32xbf16, #tpu.memory_space<vmem>>, vector<8x32xbf16>
    %cst_28 = arith.constant dense<0.000000e+00> : vector<2x32xf32>
    %41 = tpu.matmul %39, %40, %cst_28 {dimension_numbers = #tpu.dot_dimension_numbers<[1], [0], [0], [1], [0, 0, 1, 1], [], []>} : vector<2x8xbf16>, vector<8x32xbf16>, vector<2x32xf32> -> vector<2x32xf32>
    %c3 = arith.constant 3 : index
    %c0_29 = arith.constant 0 : index
    %42 = vector.load %arg10[%c3, %c0_29] : memref<4x32xf32, #tpu.memory_space<vmem>>, vector<1x32xf32>
    %43 = vector.broadcast %42 : vector<1x32xf32> to vector<2x32xf32>
    %44 = arith.addf %41, %43 : vector<2x32xf32>
    %cst_30 = arith.constant 0.000000e+00 : f32
    %45 = vector.broadcast %cst_30 : f32 to vector<2x32xf32>
    %46 = arith.maximumf %44, %45 : vector<2x32xf32>
    %47 = arith.truncf %46 : vector<2x32xf32> to vector<2x32xbf16>
    %c0_31 = arith.constant 0 : index
    %c0_32 = arith.constant 0 : index
    %48 = vector.load %arg9[%c0_31, %c0_32] : memref<32x128xbf16, #tpu.memory_space<vmem>>, vector<32x128xbf16>
    %cst_33 = arith.constant dense<0.000000e+00> : vector<2x128xf32>
    %49 = tpu.matmul %47, %48, %cst_33 {dimension_numbers = #tpu.dot_dimension_numbers<[1], [0], [0], [1], [0, 0, 1, 1], [], []>} : vector<2x32xbf16>, vector<32x128xbf16>, vector<2x128xf32> -> vector<2x128xf32>
    %50 = arith.addf %30, %49 : vector<2x128xf32>
    %c0_34 = arith.constant 0 : index
    %c0_35 = arith.constant 0 : index
    %51 = vector.load %arg12[%c0_34, %c0_35] : memref<2x128xf32, #tpu.memory_space<vmem>>, vector<2x128xf32>
    tpu.vector_store %arg12[%c0_34, %c0_35], %50 {strides = array<i32>} : memref<2x128xf32, #tpu.memory_space<vmem>>, vector<2x128xf32>,
    return
  }
  func.func @transform_0(%arg0: i32) -> (i32, i32) {
    %c0_i32 = arith.constant 0 : i32
    %c0_i32_0 = arith.constant 0 : i32
    return %arg0, %c0_i32 : i32, i32
  }
  func.func @transform_1(%arg0: i32) -> (i32, i32) {
    %c0_i32 = arith.constant 0 : i32
    %c0_i32_0 = arith.constant 0 : i32
    return %arg0, %c0_i32 : i32, i32
  }
  func.func @transform_2(%arg0: i32) -> (i32, i32) {
    %c0_i32 = arith.constant 0 : i32
    %c0_i32_0 = arith.constant 0 : i32
    return %arg0, %c0_i32 : i32, i32
  }
  func.func @transform_3(%arg0: i32) -> (i32, i32) {
    %c0_i32 = arith.constant 0 : i32
    %c0_i32_0 = arith.constant 0 : i32
    %c0_i32_1 = arith.constant 0 : i32
    return %c0_i32, %c0_i32_0 : i32, i32
  }
  func.func @transform_4(%arg0: i32) -> (i32, i32) {
    %c0_i32 = arith.constant 0 : i32
    %c0_i32_0 = arith.constant 0 : i32
    %c0_i32_1 = arith.constant 0 : i32
    return %c0_i32, %c0_i32_0 : i32, i32
  }
  func.func @transform_5(%arg0: i32) -> (i32, i32) {
    %c0_i32 = arith.constant 0 : i32
    %c0_i32_0 = arith.constant 0 : i32
    %c0_i32_1 = arith.constant 0 : i32
    return %c0_i32, %c0_i32_0 : i32, i32
  }
  func.func @transform_6(%arg0: i32) -> (i32, i32) {
    %c0_i32 = arith.constant 0 : i32
    %c0_i32_0 = arith.constant 0 : i32
    %c0_i32_1 = arith.constant 0 : i32
    return %c0_i32, %c0_i32_0 : i32, i32
  }
  func.func @transform_7(%arg0: i32) -> (i32, i32) {
    %c0_i32 = arith.constant 0 : i32
    %c0_i32_0 = arith.constant 0 : i32
    %c0_i32_1 = arith.constant 0 : i32
    return %c0_i32, %c0_i32_0 : i32, i32
  }
  func.func @transform_8(%arg0: i32) -> (i32, i32) {
    %c0_i32 = arith.constant 0 : i32
    %c0_i32_0 = arith.constant 0 : i32
    %c0_i32_1 = arith.constant 0 : i32
    return %c0_i32, %c0_i32_0 : i32, i32
  }
  func.func @transform_9(%arg0: i32) -> (i32, i32) {
    %c0_i32 = arith.constant 0 : i32
    %c0_i32_0 = arith.constant 0 : i32
    %c0_i32_1 = arith.constant 0 : i32
    return %c0_i32, %c0_i32_0 : i32, i32
  }
  func.func @transform_10(%arg0: i32) -> (i32, i32) {
    %c0_i32 = arith.constant 0 : i32
    %c0_i32_0 = arith.constant 0 : i32
    %c0_i32_1 = arith.constant 0 : i32
    return %c0_i32, %c0_i32_0 : i32, i32
  }
  func.func @transform_11(%arg0: i32) -> (i32, i32) {
    %c0_i32 = arith.constant 0 : i32
    %c0_i32_0 = arith.constant 0 : i32
    return %arg0, %c0_i32 : i32, i32
  }
}

</mosaic_0001>

<bundles_post_ra>
// kernel: graphvae_forward.1
= control target key start
LH: loop header
LB: loop body
LE: loop exit
PB: predicated region body
PF: predicated region fallthrough
CT: control target
= control target key end

     0   :  { %vm56_vm0 = vcmask 1041408   ;;  %v584_v0 = vmov 0.0   ;;  %vm585_vm1 = vmmov 0   ;;  %vm52_vm2 = vcmask 31744   ;;  %s586_s20 = smov 120   ;;  %s733_s3 = inlined_call_operand.vmem [shape: bf16[4,32], index: 3, kind: input, shape index: {}]   ;;  %s734_s0 = inlined_call_operand.vmem [shape: bf16[16,4], index: 0, kind: input, shape index: {}]   ;;  %s735_s4 = inlined_call_operand.vmem [shape: bf16[32,32], index: 4, kind: input, shape index: {}]   ;;  %s736_s9 = inlined_call_operand.vmem [shape: f32[4,32], index: 9, kind: input, shape index: {}]   ;;  %s737_s5 = inlined_call_operand.vmem [shape: bf16[32,32], index: 5, kind: input, shape index: {}]   ;;  %s738_s1 = inlined_call_operand.vmem [shape: bf16[2,16], index: 1, kind: input, shape index: {}]   ;;  %s739_s7 = inlined_call_operand.vmem [shape: bf16[32,128], index: 7, kind: input, shape index: {}]   ;;  %s740_s10 = inlined_call_operand.vmem [shape: f32[1,128], index: 10, kind: input, shape index: {}]   ;;  %s741_s6 = inlined_call_operand.vmem [shape: bf16[8,32], index: 6, kind: input, shape index: {}]   ;;  %s742_s2 = inlined_call_operand.vmem [shape: f32[2,8], index: 2, kind: input, shape index: {}]   ;;  %s743_s8 = inlined_call_operand.vmem [shape: bf16[32,128], index: 8, kind: input, shape index: {}]   ;;  %s744_s11 = inlined_call_operand.vmem [shape: f32[2,128], index: 11, kind: output, shape index: {}]  }
   0x1   :  { %520 = vmatprep.subr.bf16.mxu0 %v584_v0  ;;  %v41_v1 = vld [vmem:[%s733_s3] sm:$0x3]  ;;  %522 = vmatprep.mubr.msk.bf16.mxu0 %vm585_vm1, %v584_v0  ;;  %v575_v5 = vld [vmem:[%s735_s4 + $0x8] sm:$0xff]   ;;  %vm125_vm3 = vcmask 261120   ;;  %vm172_vm4 = vcmask 130048   ;;  %vm370_vm5 = vcmask 1043456  }
   0x2   :  { %v58_v2 = vsel %vm56_vm0, %v41_v1, 0  ;;  %v573_v3 = vld [vmem:[%s734_s0] sm:$0xff]   ;;  %526 = vmatprep.subr.bf16.mxu1 %v584_v0  ;;  %530 = vmatprep.mubr.msk.bf16.mxu1 %vm585_vm1, %v584_v0  ;;  %v577_v26 = vld [vmem:[%s737_s5 + $0x8] sm:$0xff]   ;;  %vm366_vm6 = vcmask 64512  }
   0x3   :  { %521 = vmatpush3.bf16.msra.mxu0 %v58_v2  ;;  %v574_v4 = vld [vmem:[%s735_s4] sm:$0xff]   ;;  %v579_v33 = vld [vmem:[%s739_s7 + $0x8] sm:$0xff]  }
   0x4   :  { %534 = vmatprep.subr.bf16.mxu0 %v584_v0  ;;  %527 = vmatpush3.bf16.msra.mxu1 %v574_v4  ;;  %v481_v6 = vld [vmem:[%s736_s9] ss:$0 sm:$0xff]  ;;  %v484_v17 = vld [vmem:[%s736_s9 + $0x1] ss:$0 sm:$0xff]  ;;  %v489_v34 = vld [vmem:[%s736_s9 + $0x2] ss:$0 sm:$0xff] }
   0x5   :  { %528 = vmatprep.subr.bf16.mxu1 %v584_v0  ;;  %v576_v16 = vld [vmem:[%s737_s5] sm:$0xff]   ;;  %v581_v59 = vld [vmem:[%s743_s8 + $0x8] sm:$0xff]  }
   0x6   :  { %523 = vmatmul.mubr.msk.bf16.vlgmr.msra.gmra.mrb[0].mxu0 %vm52_vm2, %v573_v3  ;;  %v170_v25 = vld [vmem:[%s738_s1] sm:$0x1]  ;;  %v497_v60 = vld [vmem:[%s736_s9 + $0x3] ss:$0 sm:$0xff] }
   0x7   :  { %536 = vmatprep.mubr.msk.bf16.mxu0 %vm585_vm1, %v584_v0  ;;  %v578_v32 = vld [vmem:[%s739_s7] sm:$0xff]  }
   0x8   :  { %529 = vmatpush3.bf16.msra.mxu1 %v575_v5  ;;  %v493_v42 = vld [vmem:[%s740_s10] ss:$0 sm:$0xff] }
   0x9   :  { %540 = vmatprep.subr.bf16.mxu1 %v584_v0  ;;  %v360_v50 = vld [vmem:[%s741_s6] sm:$0xf] }
   0xa   :  { %v372_v51 = vsel %vm370_vm5, %v360_v50, 0  ;;  %v349_v53 = vld [vmem:[%s742_s2] sm:$0x3] }
   0xb   :  { %v580_v58 = vld [vmem:[%s743_s8] sm:$0xff]  }
  0xd9   :  { %v94_v7 = vpop.f32.mrb[0].mxu0 }
  0xda   :  { %v95_v8 = vadd.f32 %v481_v6, %v94_v7  ;;  %v524_v9 = vpop.f32.mrb[1].mxu0 }
  0xdb   :  { %v97_v10 = vpop.f32.mrb[2].mxu0 }
  0xdc   :  { %v98_v11 = vadd.f32 %v481_v6, %v97_v10  ;;  %v525_v12 = vpop.f32.mrb[3].mxu0  ;;  %v101_v13 = vmax.f32 %v95_v8, 0.0 }
  0xde   :  { %v102_v14 = vmax.f32 %v98_v11, 0.0 }
  0xe0   :  { %v103_v15 = vpack.c.bf16 %v102_v14, %v101_v13 }
  0xe2   :  { %531 = vmatmul.mubr.msk.bf16.vlgmr.msra.gmra.mrb[0].mxu1 %vm125_vm3, %v103_v15 }
  0xe3   :  { %544 = vmatprep.mubr.msk.bf16.mxu1 %vm585_vm1, %v584_v0  ;;  %541 = vmatpush3.bf16.msra.mxu1 %v576_v16 }
  0xe4   :  { %542 = vmatprep.subr.bf16.mxu1 %v584_v0 }
  0xe7   :  { %543 = vmatpush3.bf16.msra.mxu1 %v577_v26 }
  0xe8   :  { %556 = vmatprep.subr.bf16.mxu1 %v584_v0 }
 0x1b5   :  { %v163_v18 = vpop.f32.mrb[0].mxu1 }
 0x1b6   :  { %v532_v19 = vpop.f32.mrb[1].mxu1  ;;  %v164_v21 = vadd.f32 %v484_v17, %v163_v18 }
 0x1b7   :  { %v166_v20 = vpop.f32.mrb[2].mxu1 }
 0x1b8   :  { %v167_v22 = vadd.f32 %v484_v17, %v166_v20  ;;  %v533_v23 = vpop.f32.mrb[3].mxu1 }
 0x1ba   :  { %v171_v24 = vpack.c.bf16 %v167_v22, %v164_v21 }
 0x1bc   :  { %535 = vmatpush3.bf16.msra.mxu0 %v171_v24 }
 0x1bd   :  { %548 = vmatprep.subr.bf16.mxu0 %v584_v0 }
 0x1bf   :  { %537 = vmatmul.mubr.msk.bf16.vlgmr.msra.gmra.mrb[4].mxu0 %vm172_vm4, %v170_v25 }
 0x1c0   :  { %552 = vmatprep.mubr.msk.bf16.mxu0 %vm585_vm1, %v584_v0  ;;  %549 = vmatpush3.bf16.msra.mxu0 %v578_v32 }
 0x1c1   :  { %550 = vmatprep.subr.bf16.mxu0 %v584_v0 }
 0x1c4   :  { %551 = vmatpush3.bf16.msra.mxu0 %v579_v33 }
 0x1c5   :  { %562 = vmatprep.subr.bf16.mxu0 %v584_v0 }
 0x292   :  { %v210_v27 = vpop.f32.mrb[4].mxu0 }
 0x293   :  { %v216_v28 = vpack.c.bf16 %v210_v27, %v210_v27  ;;  %v538_v29 = vpop.f32.mrb[5].mxu0 }
 0x294   :  { %v213_v30 = vpop.f32.mrb[6].mxu0 }
 0x295   :  { %545 = vmatmul.mubr.msk.bf16.vlgmr.msra.gmra.mrb[4].mxu1 %vm125_vm3, %v216_v28  ;;  %v539_v31 = vpop.f32.mrb[7].mxu0 }
 0x296   :  { %558 = vmatprep.mubr.msk.bf16.mxu1 %vm585_vm1, %v584_v0  ;;  %557 = vmatpush3.bf16.msra.mxu1 %v372_v51 }
 0x368   :  { %v275_v35 = vpop.f32.mrb[4].mxu1 }
 0x369   :  { %v276_v36 = vadd.f32 %v489_v34, %v275_v35  ;;  %v546_v37 = vpop.f32.mrb[5].mxu1 }
 0x36a   :  { %v278_v38 = vpop.f32.mrb[6].mxu1 }
 0x36b   :  { %v281_v39 = vmax.f32 %v276_v36, 0.0  ;;  %v547_v40 = vpop.f32.mrb[7].mxu1 }
 0x36d   :  { %v282_v41 = vpack.c.bf16 %v281_v39, %v281_v39 }
 0x36f   :  { %553 = vmatmul.mubr.msk.bf16.vlgmr.msra.gmra.mrb[8].mxu0 %vm125_vm3, %v282_v41 }
 0x370   :  { %566 = vmatprep.mubr.msk.bf16.mxu0 %vm585_vm1, %v584_v0  ;;  %563 = vmatpush3.bf16.msra.mxu0 %v580_v58 }
 0x371   :  { %564 = vmatprep.subr.bf16.mxu0 %v584_v0 }
 0x374   :  { %565 = vmatpush3.bf16.msra.mxu0 %v581_v59 }
 0x442   :  { %v343_v43 = vpop.f32.mrb[8].mxu0 }
 0x443   :  { %v344_v44 = vadd.f32 %v493_v42, %v343_v43  ;;  %v554_v45 = vpop.f32.mrb[9].mxu0 }
 0x444   :  { %v346_v46 = vpop.f32.mrb[10].mxu0 }
 0x445   :  { %v350_v47 = vmul.f32 0.5, %v344_v44  ;;  %v555_v48 = vpop.f32.mrb[11].mxu0 }
 0x447   :  { %v351_v49 = vmul.f32 1.442695, %v350_v47 }
 0x449   :  { %582 = vpow2.f32 %v351_v49 }
 0x453   :  { %v583_v52 = vpop.eup %582 }
 0x454   :  { %354 = vrot.lane.b32.xlu0 %v583_v52, %s586_s20 }
 0x4c6   :  { %v355_v54 = vpop.permute.xlu0 %354 }
 0x4c7   :  { %v357_v55 = vmul.f32 %v355_v54, %v349_v53 }
 0x4c9   :  { %v358_v56 = vadd.f32 %v357_v55, %v344_v44 }
 0x4cb   :  { %v359_v57 = vpack.c.bf16 %v358_v56, %v358_v56 }
 0x4cd   :  { %559 = vmatmul.mubr.msk.bf16.vlgmr.msra.gmra.mrb[8].mxu1 %vm366_vm6, %v359_v57 }
 0x5a0   :  { %v408_v61 = vpop.f32.mrb[8].mxu1 }
 0x5a1   :  { %v409_v62 = vadd.f32 %v497_v60, %v408_v61  ;;  %v560_v63 = vpop.f32.mrb[9].mxu1 }
 0x5a2   :  { %v411_v1 = vpop.f32.mrb[10].mxu1 }
 0x5a3   :  { %v414_v2 = vmax.f32 %v409_v62, 0.0  ;;  %v561_v3 = vpop.f32.mrb[11].mxu1 }
 0x5a5   :  { %v415_v4 = vpack.c.bf16 %v414_v2, %v414_v2 }
 0x5a7   :  { %567 = vmatmul.mubr.msk.bf16.vlgmr.msra.gmra.mrb[12].mxu0 %vm125_vm3, %v415_v4 }
 0x67a   :  { %v469_v5 = vpop.f32.mrb[12].mxu0 }
 0x67b   :  { %v475_v0 = vadd.f32 %v469_v5, %v344_v44  ;;  %v568_v6 = vpop.f32.mrb[13].mxu0 }
 0x67c   :  { %v472_v7 = vpop.f32.mrb[14].mxu0 }
 0x67d   :  { %476 = vst [vmem:[%s744_s11] sm:$0x3] %v475_v0  ;;  %v569_v8 = vpop.f32.mrb[15].mxu0 }

</bundles_post_ra>
